<compile_context>
chip_gen: v7x
topology: tpu7x:2x2x1
jax: 0.10.0
libtpu: 0.0.40
codegen_flags: <defaults>
</compile_context>

<pallas_src>
import jax
import jax.numpy as jnp
import numpy as np
from jax.experimental import pallas as pl
from jax.experimental.pallas import tpu as pltpu


def _make_basic_conv2d_kernel(KH, KW, dilation, Ho, Wp, Cin, Cout, bb):
    """Factory closing over the static conv geometry."""
    HoWp = Ho * Wp
    K = KH * KW * Cin

    def kernel(x_ref, w_ref, scale_ref, shift_ref, o_ref, patch_ref):
        # x_ref:     (bb, Cin, Hp*Wp + tail) bf16  padded, channels-first, flat spatial
        # w_ref:     (Cout, K) bf16                reshaped conv weight (tap-major, ci minor)
        # scale_ref: (Cout, 1) f32                 folded BatchNorm scale
        # shift_ref: (Cout, 1) f32                 folded BatchNorm shift
        # o_ref:     (bb, Cout, Ho*Wp)             "wide" output (columns x >= Wo are garbage)
        # patch_ref: VMEM scratch (K, Ho*Wp) bf16  im2col slab (fully overwritten each image)
        w = w_ref[...]
        scale = scale_ref[...]
        shift = shift_ref[...]
        for b in range(bb):
            # Lane-dense im2col: each tap is a contiguous flat-shifted slice of the padded
            # image, written as a full-width (Cin, Ho*Wp) row strip of the slab.
            for dy in range(KH):
                for dx in range(KW):
                    off = (dy * Wp + dx) * dilation
                    r0 = (dy * KW + dx) * Cin
                    patch_ref[r0:r0 + Cin, :] = x_ref[b, :, off:off + HoWp]
            # One big-K MXU matmul, N = Ho*Wp in lanes, f32 accumulation.
            acc = jnp.dot(w, patch_ref[...], preferred_element_type=jnp.float32)
            # Inference-mode BatchNorm fold; lane-dense store. (No ReLU in forward.)
            o_ref[b] = (acc * scale + shift).astype(o_ref.dtype)

    return kernel


def _ceil_to(v, m):
    return (v + m - 1) // m * m


def basic_conv2d_forward(x, w, gamma, beta, running_mean, running_var, *,
                         stride=1, padding=1, dilation=1, eps=1e-5,
                         batch_block=1):
    """BasicConv2d forward. x: NCHW (B, Cin, H, W); w: OIHW (Cout, Cin, KH, KW).

    Returns NCHW (B, Cout, Ho, Wo) in x.dtype.
    """
    assert stride == 1, "stride > 1 not implemented"  # TODO(synk)
    B, Cin, H, W = x.shape
    Cout, Cin_w, KH, KW = w.shape
    assert Cin_w == Cin

    Ho = H + 2 * padding - dilation * (KH - 1)
    Wo = W + 2 * padding - dilation * (KW - 1)
    Hp = H + 2 * padding
    Wp = W + 2 * padding
    HoWp = Ho * Wp
    K = KH * KW * Cin
    tail = (KW - 1) * dilation          # last tap's flat slice runs past Hp*Wp by `tail`
    Lflat = Hp * Wp + tail

    bb = batch_block
    assert B % bb == 0

    # Wrapper glue (fused by XLA): spatial zero-pad, flatten, tail pad, single bf16 cast.
    # No layout transpose anywhere -- the kernel works channels-first (N, C, H*W).
    xp = jnp.pad(x, ((0, 0), (0, 0), (padding, padding), (padding, padding)))
    xp = xp.reshape(B, Cin, Hp * Wp)
    xp = jnp.pad(xp, ((0, 0), (0, 0), (0, tail))).astype(jnp.bfloat16)

    # OIHW -> (Cout, KH, KW, Cin) -> (Cout, K): column k = (dy*KW + dx)*Cin + ci matches slab.
    w2d = jnp.transpose(w, (0, 2, 3, 1)).reshape(Cout, K).astype(jnp.bfloat16)

    # Fold inference-mode BatchNorm into per-channel scale/shift (f32, applied post-matmul).
    inv_std = jax.lax.rsqrt(running_var.astype(jnp.float32) + eps)
    scale = (gamma * inv_std).reshape(Cout, 1).astype(jnp.float32)
    shift = (beta - running_mean * gamma * inv_std).reshape(Cout, 1).astype(jnp.float32)

    kernel = _make_basic_conv2d_kernel(KH, KW, dilation, Ho, Wp, Cin, Cout, bb)

    # VMEM budget derived from the actual per-step buffers (double-buffered blocks + slab).
    x_blk = bb * _ceil_to(Cin, 16) * _ceil_to(Lflat, 128) * 2
    w_blk = _ceil_to(Cout, 16) * _ceil_to(K, 128) * 2
    ss_blk = 2 * _ceil_to(Cout, 8) * 128 * 4
    o_blk = bb * _ceil_to(Cout, 8) * _ceil_to(HoWp, 128) * 4
    slab = _ceil_to(K, 16) * _ceil_to(HoWp, 128) * 2
    vmem_bytes = 2 * (x_blk + w_blk + ss_blk + o_blk) + slab + (4 << 20)
    vmem_bytes = int(min(max(vmem_bytes, 8 << 20), 100 << 20))

    out_wide = pl.pallas_call(
        kernel,
        out_shape=jax.ShapeDtypeStruct((B, Cout, HoWp), x.dtype),
        grid=(B // bb,),
        in_specs=[
            pl.BlockSpec((bb, Cin, Lflat), lambda i: (i, 0, 0)),
            pl.BlockSpec((Cout, K), lambda i: (0, 0)),
            pl.BlockSpec((Cout, 1), lambda i: (0, 0)),
            pl.BlockSpec((Cout, 1), lambda i: (0, 0)),
        ],
        out_specs=pl.BlockSpec((bb, Cout, HoWp), lambda i: (i, 0, 0)),
        scratch_shapes=[pltpu.VMEM((K, HoWp), jnp.bfloat16)],
        compiler_params=pltpu.CompilerParams(
            dimension_semantics=("parallel",),
            vmem_limit_bytes=vmem_bytes,
        ),
    )(xp, w2d, scale, shift)

    # Crop the garbage columns (x >= Wo); result is already NCHW -- no output transpose.
    return out_wide.reshape(B, Cout, Ho, Wp)[:, :, :, :Wo]


def reference_basic_conv2d(x, w, gamma, beta, running_mean, running_var, *,
                           stride=1, padding=1, dilation=1, eps=1e-5):
    """Pure-JAX f32 reference matching the PyTorch forward in eval mode (no ReLU)."""
    y = jax.lax.conv_general_dilated(
        x, w, window_strides=(stride, stride),
        padding=((padding, padding), (padding, padding)),
        rhs_dilation=(dilation, dilation),
        dimension_numbers=("NCHW", "OIHW", "NCHW"))
    inv = jax.lax.rsqrt(running_var + eps)
    y = (y - running_mean[None, :, None, None]) * inv[None, :, None, None]
    return y * gamma[None, :, None, None] + beta[None, :, None, None]


if __name__ == "__main__":
    key = jax.random.PRNGKey(0)
    B, Cin, Cout, H, W = 2, 4, 8, 16, 16
    k1, k2, k3, k4, k5, k6 = jax.random.split(key, 6)

    x = jax.random.normal(k1, (B, Cin, H, W), jnp.float32)

    # Conv2d init mirrors weight_init: kaiming_normal_(fan_in, relu) -> std = sqrt(2/fan_in),
    # bias=False for BasicConv2d's conv.
    fan_in = Cin * 3 * 3
    w = jax.random.normal(k2, (Cout, Cin, 3, 3), jnp.float32) * np.sqrt(2.0 / fan_in)

    # Deterministic, non-trivial BN parameters / running stats to exercise the BN fold.
    gamma = 1.0 + 0.1 * jax.random.normal(k3, (Cout,), jnp.float32)
    beta = 0.1 * jax.random.normal(k4, (Cout,), jnp.float32)
    running_mean = 0.1 * jax.random.normal(k5, (Cout,), jnp.float32)
    running_var = jax.random.uniform(k6, (Cout,), jnp.float32, minval=0.5, maxval=1.5)

    out = basic_conv2d_forward(x, w, gamma, beta, running_mean, running_var,
                               stride=1, padding=1, dilation=1, batch_block=1)
    out = jax.block_until_ready(out)

    ref = reference_basic_conv2d(x, w, gamma, beta, running_mean, running_var,
                                 stride=1, padding=1, dilation=1)
    # Tolerance accounts for bf16 MXU operands (f32 accumulation).
    np.testing.assert_allclose(np.asarray(out), np.asarray(ref), rtol=2e-2, atol=2e-2)

    print("KERNEL_OK")
</pallas_src>

<mosaic_0001>
module attributes {stable_mosaic.version = 11 : i64} {
  func.func @kernel(%arg0: i32, %arg1: memref<1x4x326xbf16, #tpu.memory_space<vmem>>, %arg2: memref<8x36xbf16, #tpu.memory_space<vmem>>, %arg3: memref<8x1xf32, #tpu.memory_space<vmem>>, %arg4: memref<8x1xf32, #tpu.memory_space<vmem>>, %arg5: memref<1x8x288xf32, #tpu.memory_space<vmem>>, %arg6: memref<36x288xbf16, #tpu.memory_space<vmem>>) attributes {dimension_semantics = [#tpu.dimension_semantics<parallel>], iteration_bounds = array<i64: 2>, scalar_prefetch = 0 : i64, scratch_operands = 1 : i64, tpu.core_type = #tpu.core_type<tc>, window_params = [{transform_indices = @transform_0, window_bounds = array<i64: 1, 4, 326>}, {pipeline_mode = #tpu.pipeline_mode<synchronous>, transform_indices = @transform_1, window_bounds = array<i64: 8, 36>}, {pipeline_mode = #tpu.pipeline_mode<synchronous>, transform_indices = @transform_2, window_bounds = array<i64: 8, 1>}, {pipeline_mode = #tpu.pipeline_mode<synchronous>, transform_indices = @transform_3, window_bounds = array<i64: 8, 1>}, {transform_indices = @transform_4, window_bounds = array<i64: 1, 8, 288>}]} {
    %c0 = arith.constant 0 : index
    %c0_0 = arith.constant 0 : index
    %0 = vector.load %arg2[%c0, %c0_0] : memref<8x36xbf16, #tpu.memory_space<vmem>>, vector<8x36xbf16>
    %c0_1 = arith.constant 0 : index
    %c0_2 = arith.constant 0 : index
    %1 = vector.load %arg3[%c0_1, %c0_2] : memref<8x1xf32, #tpu.memory_space<vmem>>, vector<8x1xf32>
    %c0_3 = arith.constant 0 : index
    %c0_4 = arith.constant 0 : index
    %2 = vector.load %arg4[%c0_3, %c0_4] : memref<8x1xf32, #tpu.memory_space<vmem>>, vector<8x1xf32>
    %c0_5 = arith.constant 0 : index
    %c0_6 = arith.constant 0 : index
    %c0_7 = arith.constant 0 : index
    %3 = vector.load %arg1[%c0_5, %c0_6, %c0_7] : memref<1x4x326xbf16, #tpu.memory_space<vmem>>, vector<1x4x288xbf16>
    %4 = vector.shape_cast %3 : vector<1x4x288xbf16> to vector<4x288xbf16>
    %c0_8 = arith.constant 0 : index
    %c0_9 = arith.constant 0 : index
    %5 = vector.load %arg6[%c0_8, %c0_9] : memref<36x288xbf16, #tpu.memory_space<vmem>>, vector<4x288xbf16>
    tpu.vector_store %arg6[%c0_8, %c0_9], %4 {strides = array<i32>} : memref<36x288xbf16, #tpu.memory_space<vmem>>, vector<4x288xbf16>,
    %c0_10 = arith.constant 0 : index
    %c0_11 = arith.constant 0 : index
    %c1 = arith.constant 1 : index
    %6 = vector.load %arg1[%c0_10, %c0_11, %c1] : memref<1x4x326xbf16, #tpu.memory_space<vmem>>, vector<1x4x288xbf16>
    %7 = vector.shape_cast %6 : vector<1x4x288xbf16> to vector<4x288xbf16>
    %c4 = arith.constant 4 : index
    %c0_12 = arith.constant 0 : index
    %8 = vector.load %arg6[%c4, %c0_12] : memref<36x288xbf16, #tpu.memory_space<vmem>>, vector<4x288xbf16>
    tpu.vector_store %arg6[%c4, %c0_12], %7 {strides = array<i32>} : memref<36x288xbf16, #tpu.memory_space<vmem>>, vector<4x288xbf16>,
    %c0_13 = arith.constant 0 : index
    %c0_14 = arith.constant 0 : index
    %c2 = arith.constant 2 : index
    %9 = vector.load %arg1[%c0_13, %c0_14, %c2] : memref<1x4x326xbf16, #tpu.memory_space<vmem>>, vector<1x4x288xbf16>
    %10 = vector.shape_cast %9 : vector<1x4x288xbf16> to vector<4x288xbf16>
    %c8 = arith.constant 8 : index
    %c0_15 = arith.constant 0 : index
    %11 = vector.load %arg6[%c8, %c0_15] : memref<36x288xbf16, #tpu.memory_space<vmem>>, vector<4x288xbf16>
    tpu.vector_store %arg6[%c8, %c0_15], %10 {strides = array<i32>} : memref<36x288xbf16, #tpu.memory_space<vmem>>, vector<4x288xbf16>,
    %c0_16 = arith.constant 0 : index
    %c0_17 = arith.constant 0 : index
    %c18 = arith.constant 18 : index
    %12 = vector.load %arg1[%c0_16, %c0_17, %c18] : memref<1x4x326xbf16, #tpu.memory_space<vmem>>, vector<1x4x288xbf16>
    %13 = vector.shape_cast %12 : vector<1x4x288xbf16> to vector<4x288xbf16>
    %c12 = arith.constant 12 : index
    %c0_18 = arith.constant 0 : index
    %14 = vector.load %arg6[%c12, %c0_18] : memref<36x288xbf16, #tpu.memory_space<vmem>>, vector<4x288xbf16>
    tpu.vector_store %arg6[%c12, %c0_18], %13 {strides = array<i32>} : memref<36x288xbf16, #tpu.memory_space<vmem>>, vector<4x288xbf16>,
    %c0_19 = arith.constant 0 : index
    %c0_20 = arith.constant 0 : index
    %c19 = arith.constant 19 : index
    %15 = vector.load %arg1[%c0_19, %c0_20, %c19] : memref<1x4x326xbf16, #tpu.memory_space<vmem>>, vector<1x4x288xbf16>
    %16 = vector.shape_cast %15 : vector<1x4x288xbf16> to vector<4x288xbf16>
    %c16 = arith.constant 16 : index
    %c0_21 = arith.constant 0 : index
    %17 = vector.load %arg6[%c16, %c0_21] : memref<36x288xbf16, #tpu.memory_space<vmem>>, vector<4x288xbf16>
    tpu.vector_store %arg6[%c16, %c0_21], %16 {strides = array<i32>} : memref<36x288xbf16, #tpu.memory_space<vmem>>, vector<4x288xbf16>,
    %c0_22 = arith.constant 0 : index
    %c0_23 = arith.constant 0 : index
    %c20 = arith.constant 20 : index
    %18 = vector.load %arg1[%c0_22, %c0_23, %c20] : memref<1x4x326xbf16, #tpu.memory_space<vmem>>, vector<1x4x288xbf16>
    %19 = vector.shape_cast %18 : vector<1x4x288xbf16> to vector<4x288xbf16>
    %c20_24 = arith.constant 20 : index
    %c0_25 = arith.constant 0 : index
    %20 = vector.load %arg6[%c20_24, %c0_25] : memref<36x288xbf16, #tpu.memory_space<vmem>>, vector<4x288xbf16>
    tpu.vector_store %arg6[%c20_24, %c0_25], %19 {strides = array<i32>} : memref<36x288xbf16, #tpu.memory_space<vmem>>, vector<4x288xbf16>,
    %c0_26 = arith.constant 0 : index
    %c0_27 = arith.constant 0 : index
    %c36 = arith.constant 36 : index
    %21 = vector.load %arg1[%c0_26, %c0_27, %c36] : memref<1x4x326xbf16, #tpu.memory_space<vmem>>, vector<1x4x288xbf16>
    %22 = vector.shape_cast %21 : vector<1x4x288xbf16> to vector<4x288xbf16>
    %c24 = arith.constant 24 : index
    %c0_28 = arith.constant 0 : index
    %23 = vector.load %arg6[%c24, %c0_28] : memref<36x288xbf16, #tpu.memory_space<vmem>>, vector<4x288xbf16>
    tpu.vector_store %arg6[%c24, %c0_28], %22 {strides = array<i32>} : memref<36x288xbf16, #tpu.memory_space<vmem>>, vector<4x288xbf16>,
    %c0_29 = arith.constant 0 : index
    %c0_30 = arith.constant 0 : index
    %c37 = arith.constant 37 : index
    %24 = vector.load %arg1[%c0_29, %c0_30, %c37] : memref<1x4x326xbf16, #tpu.memory_space<vmem>>, vector<1x4x288xbf16>
    %25 = vector.shape_cast %24 : vector<1x4x288xbf16> to vector<4x288xbf16>
    %c28 = arith.constant 28 : index
    %c0_31 = arith.constant 0 : index
    %26 = vector.load %arg6[%c28, %c0_31] : memref<36x288xbf16, #tpu.memory_space<vmem>>, vector<4x288xbf16>
    tpu.vector_store %arg6[%c28, %c0_31], %25 {strides = array<i32>} : memref<36x288xbf16, #tpu.memory_space<vmem>>, vector<4x288xbf16>,
    %c0_32 = arith.constant 0 : index
    %c0_33 = arith.constant 0 : index
    %c38 = arith.constant 38 : index
    %27 = vector.load %arg1[%c0_32, %c0_33, %c38] : memref<1x4x326xbf16, #tpu.memory_space<vmem>>, vector<1x4x288xbf16>
    %28 = vector.shape_cast %27 : vector<1x4x288xbf16> to vector<4x288xbf16>
    %c32 = arith.constant 32 : index
    %c0_34 = arith.constant 0 : index
    %29 = vector.load %arg6[%c32, %c0_34] : memref<36x288xbf16, #tpu.memory_space<vmem>>, vector<4x288xbf16>
    tpu.vector_store %arg6[%c32, %c0_34], %28 {strides = array<i32>} : memref<36x288xbf16, #tpu.memory_space<vmem>>, vector<4x288xbf16>,
    %c0_35 = arith.constant 0 : index
    %c0_36 = arith.constant 0 : index
    %30 = vector.load %arg6[%c0_35, %c0_36] : memref<36x288xbf16, #tpu.memory_space<vmem>>, vector<36x288xbf16>
    %cst = arith.constant dense<0.000000e+00> : vector<8x288xf32>
    %31 = tpu.matmul %0, %30, %cst {dimension_numbers = #tpu.dot_dimension_numbers<[1], [0], [0], [1], [0, 0, 1, 1], [], []>} : vector<8x36xbf16>, vector<36x288xbf16>, vector<8x288xf32> -> vector<8x288xf32>
    %32 = vector.broadcast %1 : vector<8x1xf32> to vector<8x288xf32>
    %33 = arith.mulf %31, %32 : vector<8x288xf32>
    %34 = vector.broadcast %2 : vector<8x1xf32> to vector<8x288xf32>
    %35 = arith.addf %33, %34 : vector<8x288xf32>
    %c0_37 = arith.constant 0 : index
    %c0_38 = arith.constant 0 : index
    %c0_39 = arith.constant 0 : index
    %36 = vector.load %arg5[%c0_37, %c0_38, %c0_39] : memref<1x8x288xf32, #tpu.memory_space<vmem>>, vector<1x8x288xf32>
    %37 = vector.shape_cast %36 : vector<1x8x288xf32> to vector<8x288xf32>
    %38 = vector.shape_cast %35 : vector<8x288xf32> to vector<1x8x288xf32>
    tpu.vector_store %arg5[%c0_37, %c0_38, %c0_39], %38 {strides = array<i32>} : memref<1x8x288xf32, #tpu.memory_space<vmem>>, vector<1x8x288xf32>,
    return
  }
  func.func @transform_0(%arg0: i32) -> (i32, i32, i32) {
    %c0_i32 = arith.constant 0 : i32
    %c0_i32_0 = arith.constant 0 : i32
    %c0_i32_1 = arith.constant 0 : i32
    return %arg0, %c0_i32, %c0_i32_0 : i32, i32, i32
  }
  func.func @transform_1(%arg0: i32) -> (i32, i32) {
    %c0_i32 = arith.constant 0 : i32
    %c0_i32_0 = arith.constant 0 : i32
    %c0_i32_1 = arith.constant 0 : i32
    return %c0_i32, %c0_i32_0 : i32, i32
  }
  func.func @transform_2(%arg0: i32) -> (i32, i32) {
    %c0_i32 = arith.constant 0 : i32
    %c0_i32_0 = arith.constant 0 : i32
    %c0_i32_1 = arith.constant 0 : i32
    return %c0_i32, %c0_i32_0 : i32, i32
  }
  func.func @transform_3(%arg0: i32) -> (i32, i32) {
    %c0_i32 = arith.constant 0 : i32
    %c0_i32_0 = arith.constant 0 : i32
    %c0_i32_1 = arith.constant 0 : i32
    return %c0_i32, %c0_i32_0 : i32, i32
  }
  func.func @transform_4(%arg0: i32) -> (i32, i32, i32) {
    %c0_i32 = arith.constant 0 : i32
    %c0_i32_0 = arith.constant 0 : i32
    %c0_i32_1 = arith.constant 0 : i32
    return %arg0, %c0_i32, %c0_i32_0 : i32, i32, i32
  }
}

</mosaic_0001>

<bundles_post_ra>
// kernel: tpu_custom_call.1
= control target key start
LH: loop header
LB: loop body
LE: loop exit
PB: predicated region body
PF: predicated region fallthrough
CT: control target
= control target key end

     0   :  { %9 = vsyncpa [#allocation4], 0  ;;  %s1075_s0 = inlined_call_operand.vmem [shape: bf16[2,4,326], index: 0, kind: input, shape index: {}]   ;;  %s1076_s1 = inlined_call_operand.vmem [shape: bf16[8,36], index: 1, kind: input, shape index: {}]   ;;  %s1077_s2 = inlined_call_operand.vmem [shape: f32[8,1], index: 2, kind: input, shape index: {}]   ;;  %s1078_s3 = inlined_call_operand.vmem [shape: f32[8,1], index: 3, kind: input, shape index: {}]   ;;  %s1079_s4 = inlined_call_operand.hbm [shape: f32[2,8,288], index: 4, kind: output, shape index: {}]  }
   0x1   :  { %11 = vsyncpa [#allocation4 + $0x1], 0  ;;  %s915_s15 = smov 0   ;;  %s917_s16 = smov 0  }
   0x2   :  { %s919_s17 = smov 0   ;;  %s921_s18 = smov 0  }
   0x3 LB: > { %s936_s19 = sadd.s32 4294967295, %s875_s18   ;;  %s703_s20 = sadd.s32 4294967294, %s875_s18   ;;  %s875_s18 = sphi %s921_s18, %s1085_s18   ;;  %s871_s17 = sphi %s919_s17, %s1084_s17   ;;  %s867_s16 = sphi %s917_s16, %s1083_s16   ;;  %s863_s15 = sphi %s915_s15, %s1082_s15  }
   0x4   : > { %s940_s21 = sadd.s32 1, %s875_s18   ;;  %s113_s22 = sadd.s32 1, %s871_s17 }
   0x5   : > { %s110_s23 = ssub.s32 %s875_s18, %s940_s21  ;;  %p123_p0 = scmp.ne.s32.totalorder %s871_s17, %s867_s16 }
   0x6   : > { %p111_p1 = scmp.eq.s32.totalorder %s110_s23, 0  ;;  %p124_p2 = scmp.eq.s32.totalorder %s936_s19, 1 }
   0x7   : > { %p129_p3 = scmp.ne.s32.totalorder %s867_s16, %s863_s15  ;;  %p130_p4 = scmp.eq.s32.totalorder %s703_s20, 1 }
   0x8   : > { %s951_s24 = scalar_select %p111_p1, %s871_s17, %s113_s22  }
   0x9   : > { %p953_p5 = por %p124_p2, %p123_p0  ;;  %p957_p6 = por %p130_p4, %p129_p3 }
   0xa   : > { %p706_p7 = scmp.ge.s32.totalorder %s875_s18, 1  ;;  %p165_p8 = scmp.lt.s32.totalorder %s875_s18, 3 }
   0xc   : > { %p166_p9 = pnand %p706_p7, %p165_p8 }
   0xd   : > { %p191_p10 = scmp.lt.s32.totalorder (!%p166_p9), %s936_s19, 1  ;;  %v213_v0 = vlaneseq (!%p166_p9)  ;;  %v877_v1 = vmov (!%p166_p9), 1983009808   ;;  %s878_s6 = smov (!%p166_p9), 126   ;;  %vm220_vm0 = vcmask (!%p166_p9), 254976   ;;  %v882_v24 = vmov (!%p166_p9), 0.0  }
   0xe   : > { %169 = sbr.rel (%p166_p9) target bundleno = 422 (0x1a6), region = 36  ;;  %v211_v2 = vunpack.c.l.s4 (!%p166_p9), %v877_v1  ;;  %s879_s7 = smov (!%p166_p9), 127   ;;  %728 = vmatprep.subr.bf16.mxu1 (!%p166_p9), %v882_v24  ;;  %vm887_vm1 = vmmov (!%p166_p9), 0   ;;  %v888_v42 = vmov (!%p166_p9), 0   ;;  %v198_v43 = vld [vmem:[%s1077_s2] sm:$0xff] (!%p166_p9)  ;;  %vm252_vm2 = vcmask (!%p166_p9), 257026  }
   0xf   : > { %v214_v3 = vshrl.u32 (!%p166_p9), %v213_v0, 7  ;;  %s880_s8 = smov (!%p166_p9), 110   ;;  %s881_s9 = smov (!%p166_p9), 109   ;;  %734 = vmatprep.mubr.msk.bf16.mxu1 (!%p166_p9), %vm887_vm1, %v882_v24  ;;  %560 = vmatprep.mubr.bf16.mxu0 (!%p166_p9), %v888_v42  ;;  %v199_v44 = vld [vmem:[%s1078_s3] sm:$0xff] (!%p166_p9)  ;;  %vm245_vm3 = vcmask (!%p166_p9), 1043456   ;;  %vm278_vm4 = vcmask (!%p166_p9), 1031168  }
  0x10   : > { %v212_v4 = vunpack.c.0.s8 (!%p166_p9), %v211_v2  ;;  %s883_s10 = smov (!%p166_p9), 108   ;;  %s884_s11 = smov (!%p166_p9), 92   ;;  %792 = vset.pattern.permute.xlu0 (!%p166_p9), %v888_v42  ;;  %793 = vset.pattern.permute.xlu1 (!%p166_p9), %v888_v42  ;;  %vm247_vm5 = vcmask (!%p166_p9), 1039360   ;;  %vm338_vm6 = vcmask (!%p166_p9), 891904   ;;  %vm308_vm7 = vcmask (!%p166_p9), 900096  }
  0x11   : > { %s885_s12 = smov (!%p166_p9), 91   ;;  %s886_s13 = smov (!%p166_p9), 90   ;;  %vm368_vm8 = vcmask (!%p166_p9), 883712   ;;  %vm398_vm9 = vcmask (!%p166_p9), 752640   ;;  %vm428_vm10 = vcmask (!%p166_p9), 744448   ;;  %vm458_vm11 = vcmask (!%p166_p9), 736256  }
  0x12   : > { %v965_v5 = vsub.s32 (!%p166_p9), %v212_v4, %v214_v3  ;;  %vm518_vm12 = vcmask (!%p166_p9), 1041408   ;;  %vm514_vm13 = vcmask (!%p166_p9), 293888   ;;  %s188_s29 = sand.u32 (!%p166_p9), 1, %s867_s16   ;;  %vm627_vm14 = vcmask (!%p166_p9), 261120  }
  0x13   : > { %s738_s30 = smul.u32 (!%p166_p9), 24, %s188_s29 }
  0x15   : > { %s192_s27 = scalar_select %p191_p10, %s936_s19, 1 }
  0x17   : > { %s739_s28 = smul.u32 6, %s192_s27 }
  0x19   : > { %s970_s5 = scalar_lea.vmem %s1075_s0, %s739_s28 }
  0x1a   : > { %v254_v6 = vld [vmem:[%s970_s5] sm:$0x3f] }
  0x1b   : > { %v222_v7 = vld [vmem:[%s970_s5] sm:$0x3f]  ;;  %v263_v9 = vrot.slane %v254_v6, %v965_v5  ;;  %v256_v12 = vcombine.high %v254_v6, %v254_v6 }
  0x1c   : > { %v284_v8 = vld [vmem:[%s970_s5] sm:$0x3f]  ;;  %v238_v10 = vrot.slane %v222_v7, %v965_v5  ;;  %v224_v14 = vcombine.low %v222_v7, %v222_v7 }
  0x1d   : > { %v314_v11 = vld [vmem:[%s970_s5] sm:$0x3f]  ;;  %271 = vrot.lane.b32.xlu1 %v263_v9, %s878_s6  ;;  %v300_v15 = vrot.slane %v284_v8, %v965_v5  ;;  %v270_v19 = vrot.slane %v256_v12, %v965_v5  ;;  %v286_v21 = vcombine.low %v284_v8, %v284_v8 }
  0x1e   : > { %v200_v13 = vld [vmem:[%s970_s5] sm:$0x3f]  ;;  %241 = vrot.lane.b32.xlu0 %v238_v10, %s879_s7  ;;  %v323_v16 = vrot.slane %v314_v11, %v965_v5  ;;  %v316_v17 = vcombine.high %v314_v11, %v314_v11  ;;  %v231_v20 = vrot.slane %v224_v14, %v965_v5 }
  0x1f   : > { %708 = vst.sshfl [vmem:[#allocation2] sm:$0xf pattern:$0x76325410] %v200_v13  ;;  %v202_v18 = vcombine.high %v200_v13, %v200_v13  ;;  %v344_v22 = vld [vmem:[%s970_s5] sm:$0x3f]  ;;  %v293_v26 = vrot.slane %v286_v21, %v965_v5 }
  0x20   : > { %v330_v25 = vrot.slane %v316_v17, %v965_v5  ;;  %v346_v27 = vcombine.low %v344_v22, %v344_v22  ;;  %v374_v28 = vld [vmem:[%s970_s5] sm:$0x3f]  ;;  %v360_v29 = vrot.slane %v344_v22, %v965_v5 }
  0x21   : > { %303 = vrot.lane.b32.xlu1 %v300_v15, %s880_s8  ;;  %v216_v23 = vrot.slane %v202_v18, %v965_v5  ;;  %v376_v31 = vcombine.high %v374_v28, %v374_v28  ;;  %v404_v32 = vld [vmem:[%s970_s5] sm:$0x3f]  ;;  %v383_v34 = vrot.slane %v374_v28, %v965_v5 }
  0x22   : > { %331 = vrot.lane.b32.xlu0 %v323_v16, %s881_s9  ;;  %v353_v30 = vrot.slane %v346_v27, %v965_v5  ;;  %v406_v35 = vcombine.low %v404_v32, %v404_v32  ;;  %v434_v36 = vld [vmem:[%s970_s5] sm:$0x3f]  ;;  %v420_v37 = vrot.slane %v404_v32, %v965_v5  ;;  %s740_s5 = smul.u32 384, %s936_s19  ;;  %s630_s19 = scalar_lea.sflag [#allocation4], %s188_s29 }
  0x23   : > { %221 = vst.msk [vmem:[#allocation2 + $0x8] sm:$0x3] %vm220_vm0, %v216_v23  ;;  %v390_v33 = vrot.slane %v376_v31, %v965_v5  ;;  %v436_v39 = vcombine.high %v434_v36, %v434_v36  ;;  %v443_v41 = vrot.slane %v434_v36, %v965_v5 }
  0x24   : > { %v413_v38 = vrot.slane %v406_v35, %v965_v5 }
  0x25   : > { %273 = vrot.lane.b32.xlu1 %v270_v19, %s878_s6  ;;  %v450_v40 = vrot.slane %v436_v39, %v965_v5  ;;  %s190_s6 = scalar_lea.vmem [#allocation3], %s738_s30 }
  0x26   : > { %239 = vrot.lane.b32.xlu0 %v231_v20, %s879_s7  ;;  %s644_s7 = sshll.u32 %s190_s6, 4  ;;  %s1035_s7 = int_to_ptr.vmem [resolvable:$true] %s644_s7 }
  0x29   : > { %333 = vrot.lane.b32.xlu1 %v330_v25, %s881_s9 }
  0x2a   : > { %301 = vrot.lane.b32.xlu0 %v293_v26, %s880_s8 }
  0x2d   : > { %363 = vrot.lane.b32.xlu1 %v360_v29, %s883_s10 }
  0x2e   : > { %361 = vrot.lane.b32.xlu0 %v353_v30, %s883_s10  ;;  %s1033_s10 = scalar_lea.hbm %s1079_s4, %s740_s5 }
  0x31   : > { %393 = vrot.lane.b32.xlu1 %v390_v33, %s884_s11 }
  0x32   : > { %391 = vrot.lane.b32.xlu0 %v383_v34, %s884_s11  ;;  %s813_s11 = scalar_lea.vmem %s1035_s7, 384 }
  0x33   : > { %p814_p11 = scmp.ne.s32.totalorder %s1035_s7, %s813_s11 }
  0x35   : > { %423 = vrot.lane.b32.xlu1 %v420_v37, %s885_s12  ;;  %p815_p12 = pnand %p814_p11, %p953_p5 }
  0x36   : > { %421 = vrot.lane.b32.xlu0 %v413_v38, %s885_s12  ;;  %s889_s12 = smov [#allocation3]  }
  0x37   : > { %p816_p13 = pneg %p815_p12 }
  0x39   : > { %453 = vrot.lane.b32.xlu1 %v450_v40, %s886_s13 }
  0x3a   : > { %451 = vrot.lane.b32.xlu0 %v443_v41, %s886_s13  ;;  %v197_v41 = vld [vmem:[%s1076_s1] sm:$0xf]  ;;  %s817_s13 = sshll.u32 %s889_s12, 4  ;;  %s818_s13 = int_to_ptr.vmem [resolvable:$false] %s817_s13 }
  0x3b   : > { %s819_s14 = scalar_lea.vmem %s818_s13, 768  ;;  %p820_p0 = scmp.lt.s32.totalorder %s1035_s7, %s818_s13 }
  0x3c   : > { %p821_p1 = scmp.lt.s32.totalorder %s819_s14, %s813_s11 }
  0x3d   : > { %619 = vperm.xlu1 %793, %v199_v44  }
  0x3e   : > { %611 = vperm.xlu0 %792, %v198_v43   ;;  %p822_p2 = por %p821_p1, %p820_p0 }
  0x40   : > { %p823_p3 = pnand %p822_p2, %p816_p13 }
  0x8f   : > { %v272_v45 = vpop.permute.xlu1 %271 }
  0x90   : > { %v242_v46 = vpop.permute.xlu0 %241  ;;  %v275_v51 = vrot.slane %v272_v45, 4 }
  0x91   : > { %253 = vst.msk [vmem:[#allocation2 + $0x8] sm:$0xc] %vm252_vm2, %v242_v46  ;;  %v244_v52 = vrot.slane %v242_v46, 4 }
  0x93   : > { %v304_v47 = vpop.permute.xlu1 %303 }
  0x94   : > { %v332_v48 = vpop.permute.xlu0 %331  ;;  %313 = vst.msk [vmem:[#allocation2 + $0x14] sm:$0xc] %vm252_vm2, %v304_v47  ;;  %v306_v61 = vrot.slane %v304_v47, 4 }
  0x95   : > { %v335_v62 = vrot.slane %v332_v48, 4 }
  0x97   : > { %v274_v49 = vpop.permute.xlu1 %273 }
  0x98   : > { %v240_v50 = vpop.permute.xlu0 %239  ;;  %v276_v53 = vrot.slane %v274_v49, 4  ;;  %283 = vst.msk [vmem:[#allocation2 + $0x14] sm:$0x3] %vm220_vm0, %v274_v49 }
  0x99   : > { %v243_v54 = vrot.slane %v240_v50, 4 }
  0x9a   : > { %v277_v55 = vsel %vm245_vm3, %v275_v51, %v276_v53 }
  0x9b   : > { %v246_v56 = vsel %vm245_vm3, %v243_v54, %v244_v52  ;;  %v279_v57 = vsel %vm278_vm4, %v272_v45, %v277_v55  ;;  %v334_v59 = vpop.permute.xlu1 %333 }
  0x9c   : > { %v248_v58 = vsel %vm247_vm5, %v240_v50, %v246_v56  ;;  %v302_v60 = vpop.permute.xlu0 %301  ;;  %282 = vst [vmem:[#allocation2 + $0xc] sm:$0x33] %v279_v57  ;;  %v336_v63 = vrot.slane %v334_v59, 4  ;;  %343 = vst.msk [vmem:[#allocation2 + $0x20] sm:$0x3] %vm220_vm0, %v334_v59 }
  0x9d   : > { %251 = vst [vmem:[#allocation2] sm:$0xcc] %v248_v58  ;;  %v305_v0 = vrot.slane %v302_v60, 4 }
  0x9e   : > { %v337_v1 = vsel %vm245_vm3, %v335_v62, %v336_v63 }
  0x9f   : > { %v307_v2 = vsel %vm245_vm3, %v305_v0, %v306_v61  ;;  %v339_v3 = vsel %vm338_vm6, %v332_v48, %v337_v1  ;;  %v364_v5 = vpop.permute.xlu1 %363  ;;  %v803_v7 = vld [vmem:[#allocation2 + $0x8] ss:$12 sps:$4 sm:$0xff]  }
  0xa0   : > { %v309_v4 = vsel %vm308_vm7, %v302_v60, %v307_v2  ;;  %v362_v6 = vpop.permute.xlu0 %361  ;;  %342 = vst [vmem:[#allocation2 + $0x18] sm:$0x33] %v339_v3  ;;  %v366_v8 = vrot.slane %v364_v5, 4  ;;  %373 = vst.msk [vmem:[#allocation2 + $0x20] sm:$0xc] %vm252_vm2, %v364_v5  ;;  %729 = vmatpush3.bf16.msra.mxu1 %v803_v7 }
  0xa1   : > { %312 = vst [vmem:[#allocation2 + $0xc] sm:$0xcc] %v309_v4  ;;  %v365_v9 = vrot.slane %v362_v6, 4  ;;  %730 = vmatprep.subr.bf16.mxu1 %v882_v24 }
  0xa3   : > { %v367_v10 = vsel %vm245_vm3, %v365_v9, %v366_v8  ;;  %v394_v12 = vpop.permute.xlu1 %393 }
  0xa4   : > { %v369_v11 = vsel %vm368_vm8, %v362_v6, %v367_v10  ;;  %v392_v13 = vpop.permute.xlu0 %391  ;;  %v396_v14 = vrot.slane %v394_v12, 4  ;;  %403 = vst.msk [vmem:[#allocation2 + $0x2c] sm:$0x3] %vm220_vm0, %v394_v12  ;;  %v464_v17 = vld [vmem:[#allocation2] sm:$0xff] }
  0xa5   : > { %372 = vst [vmem:[#allocation2 + $0x18] sm:$0xcc] %v369_v11  ;;  %v395_v15 = vrot.slane %v392_v13, 4 }
  0xa7   : > { %v397_v16 = vsel %vm245_vm3, %v395_v15, %v396_v14  ;;  %v424_v19 = vpop.permute.xlu1 %423 }
  0xa8   : > { %v399_v18 = vsel %vm398_vm9, %v392_v13, %v397_v16  ;;  %v422_v20 = vpop.permute.xlu0 %421  ;;  %v466_v21 = vld [vmem:[#allocation2 + $0xc] sm:$0xff]  ;;  %v426_v23 = vrot.slane %v424_v19, 4  ;;  %433 = vst.msk [vmem:[#allocation2 + $0x2c] sm:$0xc] %vm252_vm2, %v424_v19 }
  0xa9   : > { %v804_v22 = vld [vmem:[#allocation2 + $0x4] ss:$12 sps:$4 sm:$0xff]   ;;  %402 = vst [vmem:[#allocation2 + $0x24] sm:$0x33] %v399_v18  ;;  %v425_v25 = vrot.slane %v422_v20, 4  ;;  %v709_v26 = vcombine.low %v464_v17, %v466_v21 }
  0xaa   : > { %528 = vmatprep.subr.bf16.mxu0 %v804_v22 }
  0xab   : > { %v427_v27 = vsel %vm245_vm3, %v425_v25, %v426_v23  ;;  %529 = vmatpush1.bf16.msra.mxu0 %v709_v26  ;;  %v454_v29 = vpop.permute.xlu1 %453 }
  0xac   : > { %v429_v28 = vsel %vm428_vm10, %v422_v20, %v427_v27  ;;  %v452_v30 = vpop.permute.xlu0 %451  ;;  %v456_v31 = vrot.slane %v454_v29, 4  ;;  %463 = vst.msk [vmem:[#allocation2 + $0x38] sm:$0x3] %vm220_vm0, %v454_v29 }
  0xad   : > { %432 = vst [vmem:[#allocation2 + $0x24] sm:$0xcc] %v429_v28  ;;  %v455_v32 = vrot.slane %v452_v30, 4 }
  0xaf   : > { %v457_v33 = vsel %vm245_vm3, %v455_v32, %v456_v31  ;;  %v806_v35 = vld [vmem:[#allocation2 + $0x20] ss:$12 sps:$4 sm:$0xff]  }
  0xb0   : > { %v459_v34 = vsel %vm458_vm11, %v452_v30, %v457_v33  ;;  %731 = vmatpush3.bf16.msra.mxu1 %v806_v35 }
  0xb1   : > { %462 = vst [vmem:[#allocation2 + $0x30] sm:$0x33] %v459_v34  ;;  %732 = vmatprep.subr.bf16.mxu1 %v882_v24 }
  0xb3   : > { %v810_v38 = vld [vmem:[#allocation2 + $0x38] ss:$0 sps:$4 sm:$0x33]  }
  0xb4   : > { %v807_v36 = vld [vmem:[#allocation2 + $0x1c] ss:$12 sps:$4 sm:$0xff]   ;;  %v809_v37 = vld [vmem:[#allocation2 + $0x18] ss:$12 sps:$4 sm:$0xff]   ;;  %v526_v39 = vsel %vm518_vm12, %v810_v38, 0 }
  0xb5   : > { %530 = vmatprep.subr.bf16.mxu0 %v807_v36  ;;  %733 = vmatpush3.bf16.msra.mxu1 %v526_v39 }
  0xb6   : > { %531 = vmatpush1.bf16.msra.mxu0 %v809_v37 }
  0xb8   : > { %v472_v40 = vld [vmem:[#allocation2 + $0x30] sm:$0x33]  ;;  %735 = vmatmul.mubr.msk.bf16.vlgmr.msra.gmra.mrb[0].mxu1 %vm514_vm13, %v197_v41 }
  0xb9   : > { %v716_v42 = vcombine.high %v472_v40, %v472_v40  ;;  %v715_v43 = vcombine.low %v472_v40, %v472_v40 }
  0xbb   : > { %718 = vmatprep.subr.msk.bf16.mxu0 %vm518_vm12, %v716_v42  ;;  %v520_v44 = vsel %vm518_vm12, %v715_v43, 0 }
  0xbc   : > { %533 = vmatpush1.bf16.msra.mxu0 %v520_v44  ;;  %v620_v46 = vpop.permute.xlu1 %619 }
  0xbd   : > { %v612_v24 = vpop.permute.xlu0 %611 }
  0xbf   : > { %719 = vmatmul.mubr.msk.bf16.vlgmr.msra.gmra.mrb[0].mxu0 %vm514_vm13, %v197_v41 }
 0x18b   : > { %v603_v45 = vpop.f32.mrb[0].mxu1 }
 0x18c   : > { %v736_v47 = vpop.f32.mrb[1].mxu1  ;;  %v616_v48 = vmul.f32 %v612_v24, %v603_v45 }
 0x18d   : > { %v606_v49 = vpop.f32.mrb[2].mxu1 }
 0x18e   : > { %v737_v50 = vpop.f32.mrb[3].mxu1  ;;  %v624_v51 = vadd.f32 %v620_v46, %v616_v48 }
 0x190   : > { %628 = vst.msk [vmem:[%s190_s6 + $0x10] sm:$0xff] %vm627_vm14, %v624_v51 }
 0x192   : > { %v562_v52 = vpop.f32.mrb[0].mxu0 }
 0x193   : > { %v614_v53 = vmul.f32 %v612_v24, %v562_v52  ;;  %v564_v54 = vpop.f32.mrb[1].mxu0 }
 0x194   : > { %v615_v55 = vmul.f32 %v612_v24, %v564_v54  ;;  %v566_v56 = vpop.f32.mrb[2].mxu0 }
 0x195   : > { %v622_v57 = vadd.f32 %v620_v46, %v614_v53  ;;  %v567_v58 = vpop.f32.mrb[3].mxu0 }
 0x196   : > { %v623_v59 = vadd.f32 %v620_v46, %v615_v55 }
 0x197   : > { %625 = vst [vmem:[%s190_s6] sm:$0xff] %v622_v57 }
 0x198   : > { %626 = vst [vmem:[%s190_s6 + $0x8] sm:$0xff] %v623_v59 }
 0x199   : > { %826 = shalt.err (!%p823_p3)
}
 0x19a   : > { %s827_s20 = scalar_lea.hbm %s1033_s10, 384  ;;  %s831_s27 = scalar_lea.hbm %s1079_s4, 768 }
 0x19b   : > { %p828_p4 = scmp.ne.s32.totalorder %s1033_s10, %s827_s20  ;;  %p832_p9 = scmp.lt.u32.totalorder %s1033_s10, %s1079_s4 }
 0x19c   : > { %p833_p10 = scmp.lt.u32.totalorder %s831_s27, %s827_s20  ;;  %p835_p12 = scmp.lt.u32.totalorder %s827_s20, %s1033_s10 }
 0x19d   : > { %p829_p7 = pnand %p828_p4, %p953_p5 }
 0x19e   : > { %p834_p11 = por %p833_p10, %p832_p9 }
 0x19f   : > { %p830_p8 = pneg %p829_p7 }
 0x1a0   : > { %p836_p13 = por %p835_p12, %p834_p11 }
 0x1a2   : > { %p837_p0 = pnand %p836_p13, %p830_p8 }
 0x1a4   : > { %840 = shalt.err (!%p837_p0)
}
 0x1a5   : > { %741 = dma.vmem_to_hbm [thread:$0]  (%p953_p5), %s1035_s7, 384, %s1033_s10, %s630_s19  }
 0x1a6 PF: > { %p747_p1 = scmp.ge.s32.totalorder %s875_s18, 2  ;;  %s656_s30 = sand.u32 1, %s863_s15  }
 0x1a7   : > { %s657_s5 = scalar_lea.sflag [#allocation4], %s656_s30 }
 0x1a8   : > { %p744_p2 = pnand %p747_p1, %p957_p6 }
 0x1aa   : > { %858 = dma.done.wait (!%p744_p2), %s657_s5, 384  }
 0x1ab   : > { %860 = vsyncadd (!%p744_p2), %s657_s5, 4294966912  ;;  %p14_p3 = scmp.ge.s32.totalorder %s940_s21, 4   ;;  %s1082_s15 = smov %s867_s16 }
 0x1ac   : > { %s1083_s16 = smov %s871_s17  ;;  %s1084_s17 = smov %s951_s24 }
 0x1ad   : > { %s1085_s18 = smov %s940_s21  ;;  %16 = sbr.rel (!%p14_p3) target bundleno = 3 (0x3), region = 71 }
 0x1b4   :  { %662 = vsyncpa [#allocation4], 1 }
 0x1b5   :  { %664 = vsyncpa [#allocation4 + $0x1], 1 }

</bundles_post_ra>
